<compile_context>
chip_gen: v7x
topology: tpu7x:2x2x1
jax: 0.10.0
libtpu: 0.0.40
codegen_flags: <defaults>
</compile_context>

<pallas_src>
import functools

import jax
import jax.numpy as jnp
from jax.experimental import pallas as pl
from jax.experimental.pallas import tpu as pltpu


# ---------------------------------------------------------------------------
# Helpers
# ---------------------------------------------------------------------------
def _round_up(x, m):
    return ((x + m - 1) // m) * m


def _pad_last(x, target):
    """Zero-pad the last dim of `x` up to `target`."""
    pad = target - x.shape[-1]
    if pad == 0:
        return x
    return jnp.pad(x, ((0, 0),) * (x.ndim - 1) + ((0, pad),))


def _pad_gates(w, H, Hp):
    """Repack last dim from [i|f|g|o] each of width H to each of width Hp."""
    if Hp == H:
        return w
    pads = [(0, 0)] * (w.ndim - 1) + [(0, Hp - H)]
    return jnp.concatenate(
        [jnp.pad(w[..., g * H:(g + 1) * H], pads) for g in range(4)], axis=-1)


def _pick_batch_block(batch, hidden_p):
    """Sublane-aligned batch tile.

    Yields >= 2 blocks whenever B >= 16 so the "parallel" batch axis can shard
    across TensorCores (v7x: 2 TCs/chip), and caps the block when H is very
    large to bound the per-block f32 gate working set.
    """
    if batch < 16:
        return batch                               # full-array block (legal)
    cap = 256 if hidden_p < 2048 else 128
    target = min(cap, max(8, batch // 2))
    for cand in range(target, 7, -1):
        if batch % cand == 0 and cand % 8 == 0:
            return cand
    return batch                                   # awkward batch: one full block


def _pick_time_block(T, block_b, gate_width):
    """Largest divisor of T (<= 32) whose gx chunk fits a modest VMEM budget.

    Amortizes per-grid-step overhead (~0.35 us / ~600 cycles) over many time
    steps and coalesces the tiny per-step DMAs.
    """
    budget = 8 * 1024 * 1024                       # bytes per gx chunk buffer
    best = 1
    for cand in range(1, min(T, 32) + 1):
        if T % cand == 0 and cand * block_b * gate_width * 4 <= budget:
            best = cand
    return best


def _vmem_limit_bytes(estimate):
    """Scoped-VMEM limit from estimated residency, with headroom.

    Raises the v5e 16 MiB default when needed; capped at v7x's 64 MiB physical.
    """
    return int(min(max(2 * estimate, 32 * 1024 * 1024), 64 * 1024 * 1024))


# ---------------------------------------------------------------------------
# Kernel 1: single LSTM step (decode path)
# ---------------------------------------------------------------------------
def _lstm_cell_kernel(x_ref, h_ref, c_ref, wih_ref, whh_ref, b_ref,
                      h_out_ref, c_out_ref, *, hidden):
    """x:(Bb,I) h,c:(Bb,H) wih:(I,4H) whh:(H,4H) bf16, b:(1,4H) f32."""
    H = hidden
    gates = (
        jnp.dot(x_ref[...].astype(jnp.bfloat16), wih_ref[...],
                preferred_element_type=jnp.float32)
        + jnp.dot(h_ref[...].astype(jnp.bfloat16), whh_ref[...],
                  preferred_element_type=jnp.float32)
        + b_ref[...]
    )
    i_g = jax.nn.sigmoid(gates[:, 0 * H:1 * H])
    f_g = jax.nn.sigmoid(gates[:, 1 * H:2 * H])
    g_g = jnp.tanh(gates[:, 2 * H:3 * H])
    o_g = jax.nn.sigmoid(gates[:, 3 * H:4 * H])

    c_new = f_g * c_ref[...] + i_g * g_g
    h_new = o_g * jnp.tanh(c_new)

    h_out_ref[...] = h_new.astype(h_out_ref.dtype)
    c_out_ref[...] = c_new.astype(c_out_ref.dtype)


@jax.jit
def _encoder_step(x3d, h0, c0, w_ih_t, w_hh_t, bias):
    """x3d:(1,B,I)  h0/c0:(1,B,H)  ->  (h1, c1) each (1,B,H)."""
    _, B, I = x3d.shape
    H = h0.shape[-1]
    fourH = 4 * H

    x2d = x3d.reshape(B, I).astype(jnp.float32)
    h2d = h0.reshape(B, H).astype(jnp.float32)
    c2d = c0.reshape(B, H).astype(jnp.float32)

    block_b = _pick_batch_block(B, H)
    nb = pl.cdiv(B, block_b)

    est = (2 * block_b * (I + 2 * H) * 4           # x/h/c blocks (dbl-buffered)
           + 2 * (I + H) * fourH * 2               # bf16 weights
           + 2 * fourH * 4                         # bias
           + 4 * block_b * H * 4                   # outputs
           + 10 * block_b * fourH * 4)             # live gate intermediates

    kernel = functools.partial(_lstm_cell_kernel, hidden=H)
    grid_spec = pltpu.PrefetchScalarGridSpec(
        num_scalar_prefetch=0,
        grid=(nb,),
        in_specs=[
            pl.BlockSpec((block_b, I), lambda b: (b, 0)),      # x
            pl.BlockSpec((block_b, H), lambda b: (b, 0)),      # h
            pl.BlockSpec((block_b, H), lambda b: (b, 0)),      # c
            pl.BlockSpec((I, fourH), lambda b: (0, 0)),        # W_ih^T (resident)
            pl.BlockSpec((H, fourH), lambda b: (0, 0)),        # W_hh^T (resident)
            pl.BlockSpec((1, fourH), lambda b: (0, 0)),        # bias   (resident)
        ],
        out_specs=(
            pl.BlockSpec((block_b, H), lambda b: (b, 0)),      # h_new
            pl.BlockSpec((block_b, H), lambda b: (b, 0)),      # c_new
        ),
    )
    h1, c1 = pl.pallas_call(
        kernel,
        out_shape=(
            jax.ShapeDtypeStruct((B, H), jnp.float32),
            jax.ShapeDtypeStruct((B, H), jnp.float32),
        ),
        grid_spec=grid_spec,
        compiler_params=pltpu.CompilerParams(
            dimension_semantics=("parallel",),
            vmem_limit_bytes=_vmem_limit_bytes(est)),
    )(x2d, h2d, c2d, w_ih_t, w_hh_t, bias)

    return h1.reshape(1, B, H), c1.reshape(1, B, H)


# ---------------------------------------------------------------------------
# Kernel 2: whole-sequence LSTM (input projection hoisted, time-chunked grid)
# ---------------------------------------------------------------------------
def _lstm_seq_kernel(gx_ref, h0_ref, c0_ref, whh_ref,
                     y_ref, h_out_ref, c_out_ref,
                     h_scr, c_scr, *, hidden, hidden_p, t_block):
    """grid = (batch_blocks, T // t_block).

    gx:(Tt,Bb,4Hp) f32 precomputed input gates; whh:(Hp,4Hp) bf16 resident;
    h/c carried in f32 VMEM scratch at the lane-aligned width Hp.
    """
    H, Hp = hidden, hidden_p
    t_chunk = pl.program_id(1)

    @pl.when(t_chunk == 0)
    def _():
        h_scr[...] = h0_ref[...]
        c_scr[...] = c0_ref[...]

    h = h_scr[...]
    c = c_scr[...]

    # Fully-unrolled static inner loop over the time chunk (t_block is a small
    # static int), so the scheduler sees straight-line code per grid step.
    for t in range(t_block):
        gates = gx_ref[t] + jnp.dot(h.astype(jnp.bfloat16), whh_ref[...],
                                    preferred_element_type=jnp.float32)
        # Lane-tile-aligned gate slices (Hp is a multiple of 128).
        i_g = jax.nn.sigmoid(gates[:, 0 * Hp:1 * Hp])
        f_g = jax.nn.sigmoid(gates[:, 1 * Hp:2 * Hp])
        g_g = jnp.tanh(gates[:, 2 * Hp:3 * Hp])
        o_g = jax.nn.sigmoid(gates[:, 3 * Hp:4 * Hp])
        c = f_g * c + i_g * g_g
        h = o_g * jnp.tanh(c)
        y_ref[t] = h[:, :H].astype(y_ref.dtype)

    h_scr[...] = h
    c_scr[...] = c

    # Final hidden/cell state: written back exactly once, on the last chunk.
    @pl.when(t_chunk == pl.num_programs(1) - 1)
    def _():
        h_out_ref[...] = h[:, :H].astype(h_out_ref.dtype)
        c_out_ref[...] = c[:, :H].astype(c_out_ref.dtype)


@jax.jit
def _encoder_sequence(x_seq, h0, c0, w_ih_t_p, w_hh_t_p, bias_p):
    """x_seq:(T,B,I), h0/c0:(1,B,H)  ->  y (T,B,H), h_T/c_T (1,B,H)."""
    T, B, I = x_seq.shape
    H = h0.shape[-1]
    Hp = w_hh_t_p.shape[0]
    G = w_hh_t_p.shape[1]                    # 4 * Hp

    # (1) Hoisted input projection: ONE big MXU matmul over the whole sequence
    #     (bf16 operands, f32 accumulation), bias folded in.
    gx = jnp.dot(x_seq.reshape(T * B, I).astype(jnp.bfloat16), w_ih_t_p,
                 preferred_element_type=jnp.float32)
    gx = (gx + bias_p).reshape(T, B, G)

    # (2) Initial state padded once to the lane-aligned per-gate width.
    h0p = _pad_last(h0.reshape(B, H).astype(jnp.float32), Hp)
    c0p = _pad_last(c0.reshape(B, H).astype(jnp.float32), Hp)

    block_b = _pick_batch_block(B, Hp)
    nb = pl.cdiv(B, block_b)
    t_block = _pick_time_block(T, block_b, G)
    nt = T // t_block

    est = (2 * t_block * block_b * G * 4     # gx chunks (double buffered)
           + 2 * t_block * block_b * H * 4   # y chunks
           + 2 * Hp * G * 2                  # resident bf16 W_hh
           + 4 * block_b * Hp * 4            # h0/c0 blocks
           + 4 * block_b * H * 4             # h_T/c_T blocks
           + 2 * block_b * Hp * 4            # h/c scratch
           + 10 * block_b * Hp * 4)          # live gate intermediates

    kernel = functools.partial(_lstm_seq_kernel, hidden=H, hidden_p=Hp,
                               t_block=t_block)
    grid_spec = pltpu.PrefetchScalarGridSpec(
        num_scalar_prefetch=0,
        grid=(nb, nt),
        in_specs=[
            pl.BlockSpec((t_block, block_b, G), lambda b, t: (t, b, 0)),  # gx chunk
            pl.BlockSpec((block_b, Hp), lambda b, t: (b, 0)),             # h0
            pl.BlockSpec((block_b, Hp), lambda b, t: (b, 0)),             # c0
            pl.BlockSpec((Hp, G), lambda b, t: (0, 0)),                   # W_hh (resident)
        ],
        out_specs=(
            pl.BlockSpec((t_block, block_b, H), lambda b, t: (t, b, 0)),  # y chunk
            pl.BlockSpec((block_b, H), lambda b, t: (b, 0)),              # h_T
            pl.BlockSpec((block_b, H), lambda b, t: (b, 0)),              # c_T
        ),
        scratch_shapes=[
            pltpu.VMEM((block_b, Hp), jnp.float32),                       # h carry
            pltpu.VMEM((block_b, Hp), jnp.float32),                       # c carry
        ],
    )
    y, h_t, c_t = pl.pallas_call(
        kernel,
        out_shape=(
            jax.ShapeDtypeStruct((T, B, H), jnp.float32),
            jax.ShapeDtypeStruct((B, H), jnp.float32),
            jax.ShapeDtypeStruct((B, H), jnp.float32),
        ),
        grid_spec=grid_spec,
        compiler_params=pltpu.CompilerParams(
            dimension_semantics=("parallel", "arbitrary"),
            vmem_limit_bytes=_vmem_limit_bytes(est)),
    )(gx, h0p, c0p, w_hh_t_p)

    return y, h_t.reshape(1, B, H), c_t.reshape(1, B, H)


# ---------------------------------------------------------------------------
# Module wrapper (mirrors the PyTorch Encoder)
# ---------------------------------------------------------------------------
class Encoder:
    """JAX/Pallas port of the PyTorch Encoder (1-layer LSTM)."""

    def __init__(self, input_size, hidden_size, num_layers=1, key=None):
        assert num_layers == 1, "Pallas port implements the default num_layers=1"
        self.input_size = input_size
        self.hidden_size = hidden_size
        self.num_layers = num_layers

        H = hidden_size
        Hp = _round_up(H, 128)               # lane-aligned per-gate width
        self.hidden_p = Hp

        if key is None:
            key = jax.random.PRNGKey(0)
        k1, k2, k3, k4 = jax.random.split(key, 4)
        bound = 1.0 / float(H) ** 0.5
        # PyTorch nn.LSTM parameter shapes (layer 0), gate order [i, f, g, o].
        w_ih = jax.random.uniform(k1, (4 * H, input_size), jnp.float32, -bound, bound)
        w_hh = jax.random.uniform(k2, (4 * H, H), jnp.float32, -bound, bound)
        b_ih = jax.random.uniform(k3, (4 * H,), jnp.float32, -bound, bound)
        b_hh = jax.random.uniform(k4, (4 * H,), jnp.float32, -bound, bound)

        # f32 copies kept only for the faithful reference check.
        self.w_ih_t_f32 = jnp.asarray(w_ih.T)                     # (I, 4H)
        self.w_hh_t_f32 = jnp.asarray(w_hh.T)                     # (H, 4H)
        self.bias_f32 = (b_ih + b_hh).reshape(1, 4 * H)           # (1, 4H)

        # Single-step (decode) params: unpadded, bf16 weights, f32 bias.
        self.w_ih_t = self.w_ih_t_f32.astype(jnp.bfloat16)        # (I, 4H)
        self.w_hh_t = self.w_hh_t_f32.astype(jnp.bfloat16)        # (H, 4H)
        self.bias = self.bias_f32                                 # (1, 4H)

        # Sequence params: per-gate width padded to a multiple of 128 lanes so
        # gate slices in the hot recurrence are lane-tile aligned; W_hh rows
        # padded to Hp so h/c are carried at the padded width.  Padded weight
        # rows/columns are zero, so real H columns are unchanged.
        self.w_ih_t_p = _pad_gates(self.w_ih_t_f32, H, Hp).astype(jnp.bfloat16)
        w_hh_p = jnp.pad(_pad_gates(self.w_hh_t_f32, H, Hp), ((0, Hp - H), (0, 0)))
        self.w_hh_t_p = w_hh_p.astype(jnp.bfloat16)                # (Hp, 4Hp)
        self.bias_p = _pad_gates(self.bias_f32, H, Hp)             # (1, 4Hp) f32

    def blank_hidden_layer(self, batch_size=1):
        z = jnp.zeros((self.num_layers, batch_size, self.hidden_size), jnp.float32)
        return (z, z)

    def __call__(self, input, hidden):
        """One LSTM time step (module forward semantics).

        input : (1, B, input_size), hidden: (h0, c0) each (1, B, hidden_size)
        returns (lstm_out (1, B, H), (h1, c1))
        """
        h0, c0 = hidden
        assert input.shape[0] == 1 and h0.shape[0] == 1 and c0.shape[0] == 1
        h1, c1 = _encoder_step(input, h0, c0, self.w_ih_t, self.w_hh_t, self.bias)
        return (h1, (h1, c1))      # last-layer output == h for a 1-layer LSTM

    def encode_sequence(self, inputs, hidden):
        """Run the whole sequence in ONE pallas_call (hoisted input projection,
        time-chunked grid, h/c carried in VMEM scratch, resident bf16 W_hh).

        inputs: (T, B, input_size), hidden: (h0, c0) each (1, B, hidden_size)
        returns (outputs (T, B, H), (h_T, c_T))
        """
        h0, c0 = hidden
        y, h_t, c_t = _encoder_sequence(inputs, h0, c0, self.w_ih_t_p,
                                        self.w_hh_t_p, self.bias_p)
        return (y, (h_t, c_t))


# ---------------------------------------------------------------------------
# Pure-JAX references (work for both bf16 and f32 weights)
# ---------------------------------------------------------------------------
def _ref_lstm_step(x, h, c, w_ih_t, w_hh_t, bias):
    Hg = w_hh_t.shape[1] // 4
    gates = (jnp.dot(x.astype(w_ih_t.dtype), w_ih_t, preferred_element_type=jnp.float32)
             + jnp.dot(h.astype(w_hh_t.dtype), w_hh_t, preferred_element_type=jnp.float32)
             + bias.astype(jnp.float32))
    i = jax.nn.sigmoid(gates[:, 0 * Hg:1 * Hg])
    f = jax.nn.sigmoid(gates[:, 1 * Hg:2 * Hg])
    g = jnp.tanh(gates[:, 2 * Hg:3 * Hg])
    o = jax.nn.sigmoid(gates[:, 3 * Hg:4 * Hg])
    c_new = f * c + i * g
    h_new = o * jnp.tanh(c_new)
    return h_new, c_new


if __name__ == "__main__":
    N_LETTER, HIDDEN, BATCH, SEQ = 16, 32, 2, 8

    key = jax.random.PRNGKey(0)
    k_param, k_in, k_seq = jax.random.split(key, 3)

    enc = Encoder(N_LETTER, HIDDEN, num_layers=1, key=k_param)
    hidden0 = enc.blank_hidden_layer(batch_size=BATCH)

    # ---- single-step forward (module semantics) ----
    letter_ids = jax.random.randint(k_in, (BATCH,), 0, N_LETTER)
    x = jax.nn.one_hot(letter_ids, N_LETTER,
                       dtype=jnp.float32).reshape(1, BATCH, N_LETTER)
    lstm_out, (h1, c1) = enc(x, hidden0)
    jax.block_until_ready((lstm_out, h1, c1))

    zeros_h = jnp.zeros((BATCH, HIDDEN), jnp.float32)
    # Matched-precision reference (same bf16 weights / f32 accumulation).
    h_m, c_m = _ref_lstm_step(x.reshape(BATCH, N_LETTER), zeros_h, zeros_h,
                              enc.w_ih_t, enc.w_hh_t, enc.bias)
    # Faithful f32 reference (PyTorch LSTM semantics, looser tol for bf16 weights).
    h_f, c_f = _ref_lstm_step(x.reshape(BATCH, N_LETTER), zeros_h, zeros_h,
                              enc.w_ih_t_f32, enc.w_hh_t_f32, enc.bias_f32)

    assert lstm_out.shape == (1, BATCH, HIDDEN)
    assert h1.shape == (1, BATCH, HIDDEN) and c1.shape == (1, BATCH, HIDDEN)
    assert jnp.allclose(lstm_out.reshape(BATCH, HIDDEN), h_m, atol=2e-3)
    assert jnp.allclose(c1.reshape(BATCH, HIDDEN), c_m, atol=2e-3)
    assert jnp.allclose(lstm_out.reshape(BATCH, HIDDEN), h_f, atol=2e-2)
    assert jnp.allclose(c1.reshape(BATCH, HIDDEN), c_f, atol=2e-2)

    # ---- whole-sequence path (recurrence inside the kernel) ----
    seq_ids = jax.random.randint(k_seq, (SEQ, BATCH), 0, N_LETTER)
    x_seq = jax.nn.one_hot(seq_ids, N_LETTER, dtype=jnp.float32)   # (T, B, I)
    y_seq, (hT, cT) = enc.encode_sequence(x_seq, hidden0)
    jax.block_until_ready((y_seq, hT, cT))

    h_m, c_m = zeros_h, zeros_h
    h_f, c_f = zeros_h, zeros_h
    ys = []
    for t in range(SEQ):
        h_m, c_m = _ref_lstm_step(x_seq[t], h_m, c_m,
                                  enc.w_ih_t, enc.w_hh_t, enc.bias)
        h_f, c_f = _ref_lstm_step(x_seq[t], h_f, c_f,
                                  enc.w_ih_t_f32, enc.w_hh_t_f32, enc.bias_f32)
        ys.append(h_m)
    y_ref = jnp.stack(ys)

    assert y_seq.shape == (SEQ, BATCH, HIDDEN)
    assert jnp.allclose(y_seq, y_ref, atol=5e-3)
    assert jnp.allclose(hT.reshape(BATCH, HIDDEN), h_m, atol=5e-3)
    assert jnp.allclose(cT.reshape(BATCH, HIDDEN), c_m, atol=5e-3)
    assert jnp.allclose(hT.reshape(BATCH, HIDDEN), h_f, atol=3e-2)
    assert jnp.allclose(cT.reshape(BATCH, HIDDEN), c_f, atol=3e-2)

    print("KERNEL_OK")
</pallas_src>

<mosaic_0001>
module attributes {stable_mosaic.version = 11 : i64} {
  func.func @_lstm_cell_kernel(%arg0: i32, %arg1: memref<2x16xf32, #tpu.memory_space<vmem>>, %arg2: memref<2x32xf32, #tpu.memory_space<vmem>>, %arg3: memref<2x32xf32, #tpu.memory_space<vmem>>, %arg4: memref<16x128xbf16, #tpu.memory_space<vmem>>, %arg5: memref<32x128xbf16, #tpu.memory_space<vmem>>, %arg6: memref<1x128xf32, #tpu.memory_space<vmem>>, %arg7: memref<2x32xf32, #tpu.memory_space<vmem>>, %arg8: memref<2x32xf32, #tpu.memory_space<vmem>>) attributes {dimension_semantics = [#tpu.dimension_semantics<parallel>], iteration_bounds = array<i64: 1>, scalar_prefetch = 0 : i64, scratch_operands = 0 : i64, tpu.core_type = #tpu.core_type<tc>, window_params = [{transform_indices = @transform_0, window_bounds = array<i64: 2, 16>}, {transform_indices = @transform_1, window_bounds = array<i64: 2, 32>}, {transform_indices = @transform_2, window_bounds = array<i64: 2, 32>}, {pipeline_mode = #tpu.pipeline_mode<synchronous>, transform_indices = @transform_3, window_bounds = array<i64: 16, 128>}, {pipeline_mode = #tpu.pipeline_mode<synchronous>, transform_indices = @transform_4, window_bounds = array<i64: 32, 128>}, {pipeline_mode = #tpu.pipeline_mode<synchronous>, transform_indices = @transform_5, window_bounds = array<i64: 1, 128>}, {transform_indices = @transform_6, window_bounds = array<i64: 2, 32>}, {transform_indices = @transform_7, window_bounds = array<i64: 2, 32>}]} {
    %c0 = arith.constant 0 : index
    %c0_0 = arith.constant 0 : index
    %0 = vector.load %arg1[%c0, %c0_0] : memref<2x16xf32, #tpu.memory_space<vmem>>, vector<2x16xf32>
    %1 = arith.truncf %0 : vector<2x16xf32> to vector<2x16xbf16>
    %c0_1 = arith.constant 0 : index
    %c0_2 = arith.constant 0 : index
    %2 = vector.load %arg4[%c0_1, %c0_2] : memref<16x128xbf16, #tpu.memory_space<vmem>>, vector<16x128xbf16>
    %cst = arith.constant dense<0.000000e+00> : vector<2x128xf32>
    %3 = tpu.matmul %1, %2, %cst {dimension_numbers = #tpu.dot_dimension_numbers<[1], [0], [0], [1], [0, 0, 1, 1], [], []>} : vector<2x16xbf16>, vector<16x128xbf16>, vector<2x128xf32> -> vector<2x128xf32>
    %c0_3 = arith.constant 0 : index
    %c0_4 = arith.constant 0 : index
    %4 = vector.load %arg2[%c0_3, %c0_4] : memref<2x32xf32, #tpu.memory_space<vmem>>, vector<2x32xf32>
    %5 = arith.truncf %4 : vector<2x32xf32> to vector<2x32xbf16>
    %c0_5 = arith.constant 0 : index
    %c0_6 = arith.constant 0 : index
    %6 = vector.load %arg5[%c0_5, %c0_6] : memref<32x128xbf16, #tpu.memory_space<vmem>>, vector<32x128xbf16>
    %cst_7 = arith.constant dense<0.000000e+00> : vector<2x128xf32>
    %7 = tpu.matmul %5, %6, %cst_7 {dimension_numbers = #tpu.dot_dimension_numbers<[1], [0], [0], [1], [0, 0, 1, 1], [], []>} : vector<2x32xbf16>, vector<32x128xbf16>, vector<2x128xf32> -> vector<2x128xf32>
    %8 = arith.addf %3, %7 : vector<2x128xf32>
    %c0_8 = arith.constant 0 : index
    %c0_9 = arith.constant 0 : index
    %9 = vector.load %arg6[%c0_8, %c0_9] : memref<1x128xf32, #tpu.memory_space<vmem>>, vector<1x128xf32>
    %10 = vector.broadcast %9 : vector<1x128xf32> to vector<2x128xf32>
    %11 = arith.addf %8, %10 : vector<2x128xf32>
    %12 = vector.extract_strided_slice %11 {offsets = [0, 0], sizes = [2, 32], strides = [1, 1]} : vector<2x128xf32> to vector<2x32xf32>
    %13 = arith.negf %12 : vector<2x32xf32>
    %14 = math.exp %13 : vector<2x32xf32>
    %cst_10 = arith.constant 1.000000e+00 : f32
    %15 = vector.broadcast %cst_10 : f32 to vector<2x32xf32>
    %16 = arith.addf %15, %14 : vector<2x32xf32>
    %17 = arith.divf %15, %16 : vector<2x32xf32>
    %18 = vector.extract_strided_slice %11 {offsets = [0, 32], sizes = [2, 32], strides = [1, 1]} : vector<2x128xf32> to vector<2x32xf32>
    %19 = arith.negf %18 : vector<2x32xf32>
    %20 = math.exp %19 : vector<2x32xf32>
    %cst_11 = arith.constant 1.000000e+00 : f32
    %21 = vector.broadcast %cst_11 : f32 to vector<2x32xf32>
    %22 = arith.addf %21, %20 : vector<2x32xf32>
    %23 = arith.divf %21, %22 : vector<2x32xf32>
    %24 = vector.extract_strided_slice %11 {offsets = [0, 64], sizes = [2, 32], strides = [1, 1]} : vector<2x128xf32> to vector<2x32xf32>
    %25 = math.tanh %24 : vector<2x32xf32>
    %26 = vector.extract_strided_slice %11 {offsets = [0, 96], sizes = [2, 32], strides = [1, 1]} : vector<2x128xf32> to vector<2x32xf32>
    %27 = arith.negf %26 : vector<2x32xf32>
    %28 = math.exp %27 : vector<2x32xf32>
    %cst_12 = arith.constant 1.000000e+00 : f32
    %29 = vector.broadcast %cst_12 : f32 to vector<2x32xf32>
    %30 = arith.addf %29, %28 : vector<2x32xf32>
    %31 = arith.divf %29, %30 : vector<2x32xf32>
    %c0_13 = arith.constant 0 : index
    %c0_14 = arith.constant 0 : index
    %32 = vector.load %arg3[%c0_13, %c0_14] : memref<2x32xf32, #tpu.memory_space<vmem>>, vector<2x32xf32>
    %33 = arith.mulf %23, %32 : vector<2x32xf32>
    %34 = arith.mulf %17, %25 : vector<2x32xf32>
    %35 = arith.addf %33, %34 : vector<2x32xf32>
    %36 = math.tanh %35 : vector<2x32xf32>
    %37 = arith.mulf %31, %36 : vector<2x32xf32>
    %c0_15 = arith.constant 0 : index
    %c0_16 = arith.constant 0 : index
    %38 = vector.load %arg7[%c0_15, %c0_16] : memref<2x32xf32, #tpu.memory_space<vmem>>, vector<2x32xf32>
    tpu.vector_store %arg7[%c0_15, %c0_16], %37 {strides = array<i32>} : memref<2x32xf32, #tpu.memory_space<vmem>>, vector<2x32xf32>,
    %c0_17 = arith.constant 0 : index
    %c0_18 = arith.constant 0 : index
    %39 = vector.load %arg8[%c0_17, %c0_18] : memref<2x32xf32, #tpu.memory_space<vmem>>, vector<2x32xf32>
    tpu.vector_store %arg8[%c0_17, %c0_18], %35 {strides = array<i32>} : memref<2x32xf32, #tpu.memory_space<vmem>>, vector<2x32xf32>,
    return
  }
  func.func @transform_0(%arg0: i32) -> (i32, i32) {
    %c0_i32 = arith.constant 0 : i32
    %c0_i32_0 = arith.constant 0 : i32
    return %arg0, %c0_i32 : i32, i32
  }
  func.func @transform_1(%arg0: i32) -> (i32, i32) {
    %c0_i32 = arith.constant 0 : i32
    %c0_i32_0 = arith.constant 0 : i32
    return %arg0, %c0_i32 : i32, i32
  }
  func.func @transform_2(%arg0: i32) -> (i32, i32) {
    %c0_i32 = arith.constant 0 : i32
    %c0_i32_0 = arith.constant 0 : i32
    return %arg0, %c0_i32 : i32, i32
  }
  func.func @transform_3(%arg0: i32) -> (i32, i32) {
    %c0_i32 = arith.constant 0 : i32
    %c0_i32_0 = arith.constant 0 : i32
    %c0_i32_1 = arith.constant 0 : i32
    return %c0_i32, %c0_i32_0 : i32, i32
  }
  func.func @transform_4(%arg0: i32) -> (i32, i32) {
    %c0_i32 = arith.constant 0 : i32
    %c0_i32_0 = arith.constant 0 : i32
    %c0_i32_1 = arith.constant 0 : i32
    return %c0_i32, %c0_i32_0 : i32, i32
  }
  func.func @transform_5(%arg0: i32) -> (i32, i32) {
    %c0_i32 = arith.constant 0 : i32
    %c0_i32_0 = arith.constant 0 : i32
    %c0_i32_1 = arith.constant 0 : i32
    return %c0_i32, %c0_i32_0 : i32, i32
  }
  func.func @transform_6(%arg0: i32) -> (i32, i32) {
    %c0_i32 = arith.constant 0 : i32
    %c0_i32_0 = arith.constant 0 : i32
    return %arg0, %c0_i32 : i32, i32
  }
  func.func @transform_7(%arg0: i32) -> (i32, i32) {
    %c0_i32 = arith.constant 0 : i32
    %c0_i32_0 = arith.constant 0 : i32
    return %arg0, %c0_i32 : i32, i32
  }
}

</mosaic_0001>

<bundles_post_ra>
// kernel: _encoder_step.1
= control target key start
LH: loop header
LB: loop body
LE: loop exit
PB: predicated region body
PF: predicated region fallthrough
CT: control target
= control target key end

     0   :  { %13 = vsyncpa [#allocation3], 0  ;;  %s502_s0 = inlined_call_operand.vmem [shape: f32[2,16], index: 0, kind: input, shape index: {}]   ;;  %s503_s1 = inlined_call_operand.hbm [shape: f32[2,32], index: 1, kind: input, shape index: {}]   ;;  %s504_s2 = inlined_call_operand.hbm [shape: f32[2,32], index: 2, kind: input, shape index: {}]   ;;  %s505_s3 = inlined_call_operand.vmem [shape: bf16[16,128], index: 3, kind: input, shape index: {}]   ;;  %s506_s4 = inlined_call_operand.vmem [shape: bf16[32,128], index: 4, kind: input, shape index: {}]   ;;  %s507_s5 = inlined_call_operand.vmem [shape: f32[1,128], index: 5, kind: input, shape index: {}]   ;;  %s508_s6 = inlined_call_operand.hbm [shape: f32[2,32], index: 6, kind: output, shape index: {0}]   ;;  %s509_s7 = inlined_call_operand.hbm [shape: f32[2,32], index: 7, kind: output, shape index: {1}]  }
   0x1   :  { %14 = vsyncpa [#allocation6], 0 }
   0x2   :  { %15 = vsyncpa [#allocation4], 0 }
   0x3   :  { %16 = vsyncpa [#allocation9], 0  ;;  %s388_s24 = smov [#allocation2]   ;;  %s389_s26 = smov [#allocation5]  }
   0x4   :  { %s25_s25 = sshll.u32 %s388_s24, 4  ;;  %s35_s27 = sshll.u32 %s389_s26, 4  ;;  %s26_s25 = int_to_ptr.vmem [resolvable:$true] %s25_s25  ;;  %s36_s27 = int_to_ptr.vmem [resolvable:$true] %s35_s27 }
   0x5   :  { %s292_s30 = scalar_lea.hbm %s503_s1, 32 }
   0x6   :  { %p293_p0 = scmp.ne.s32.totalorder %s503_s1, %s292_s30  ;;  %p296_p1 = scmp.lt.u32.totalorder %s292_s30, %s503_s1 }
   0x8   :  { %p298_p2 = pnand %p296_p1, %p293_p0 }
   0xa   :  { %301 = shalt.err (!%p298_p2)
}
   0xb   :  { %s302_s12 = scalar_lea.vmem %s26_s25, 32  ;;  %p307_p4 = scmp.lt.s32.totalorder %s26_s25, %s26_s25 }
   0xc   :  { %p303_p3 = scmp.ne.s32.totalorder %s26_s25, %s302_s12  ;;  %p308_p5 = scmp.lt.s32.totalorder %s302_s12, %s302_s12 }
   0xe   :  { %p309_p6 = por %p308_p5, %p307_p4 }
  0x10   :  { %p310_p7 = pnand %p309_p6, %p303_p3 }
  0x12   :  { %313 = shalt.err (!%p310_p7)
}
  0x13   :  { %28 = dma.hbm_to_vmem [thread:$0]  %s503_s1, 32, %s26_s25, [#allocation3]  }
  0x14   :  { %s314_s17 = scalar_lea.hbm %s504_s2, 32 }
  0x15   :  { %p315_p8 = scmp.ne.s32.totalorder %s504_s2, %s314_s17  ;;  %p318_p9 = scmp.lt.u32.totalorder %s314_s17, %s504_s2 }
  0x17   :  { %p320_p10 = pnand %p318_p9, %p315_p8 }
  0x19   :  { %323 = shalt.err (!%p320_p10)
}
  0x1a   :  { %s324_s22 = scalar_lea.vmem %s36_s27, 32  ;;  %p329_p12 = scmp.lt.s32.totalorder %s36_s27, %s36_s27 }
  0x1b   :  { %p325_p11 = scmp.ne.s32.totalorder %s36_s27, %s324_s22  ;;  %p330_p13 = scmp.lt.s32.totalorder %s324_s22, %s324_s22 }
  0x1d   :  { %p331_p0 = por %p330_p13, %p329_p12 }
  0x1f   :  { %p332_p1 = pnand %p331_p0, %p325_p11 }
  0x21   :  { %335 = shalt.err (!%p332_p1)
}
  0x22   :  { %38 = dma.hbm_to_vmem [thread:$0]  %s504_s2, 32, %s36_s27, [#allocation6]  }
  0x23   :  { %380 = dma.done.wait [#allocation3], 32  }
  0x24   :  { %381 = vsyncadd [#allocation3], 4294967264 }
  0x25   :  { %382 = dma.done.wait [#allocation6], 32  }
  0x26   :  { %383 = vsyncadd [#allocation6], 4294967264  ;;  %v390_v0 = vmov 0.0   ;;  %vm391_vm0 = vmmov 0   ;;  %v281_v1 = vld [vmem:[%s506_s4] sm:$0xff]   ;;  %v283_v3 = vld [vmem:[%s506_s4 + $0x8] sm:$0xff]  }
  0x27   :  { %258 = vmatprep.subr.bf16.mxu0 %v390_v0  ;;  %266 = vmatprep.subr.bf16.mxu1 %v390_v0  ;;  %v282_v2 = vld [vmem:[%s505_s3] sm:$0xff]   ;;  %vm124_vm1 = vcmask 130048   ;;  %vm74_vm2 = vcmask 261120   ;;  %s393_s8 = smov 32   ;;  %s395_s9 = smov [#allocation8]   ;;  %vm209_vm3 = vcmask 254976  }
  0x28   :  { %268 = vmatprep.mubr.msk.bf16.mxu1 %vm391_vm0, %v390_v0  ;;  %262 = vmatprep.mubr.msk.bf16.mxu0 %vm391_vm0, %v390_v0  ;;  %v52_v4 = vld [vmem:[%s502_s0] sm:$0x3]  ;;  %s392_s0 = smov 64   ;;  %v183_v20 = vld [vmem:[#allocation5] sm:$0x3]  ;;  %s232_s10 = sshll.u32 %s395_s9, 4  ;;  %s233_s10 = int_to_ptr.vmem [resolvable:$true] %s232_s10 }
  0x29   :  { %259 = vmatpush3.bf16.msra.mxu0 %v281_v1  ;;  %267 = vmatpush3.bf16.msra.mxu1 %v282_v2  ;;  %v56_v5 = vld [vmem:[#allocation2] sm:$0x3]  ;;  %v53_v6 = vpack.c.bf16 %v52_v4, %v52_v4  ;;  %s336_s11 = scalar_lea.vmem %s233_s10, 32  ;;  %p341_p3 = scmp.lt.s32.totalorder %s233_s10, %s233_s10 }
  0x2a   :  { %260 = vmatprep.subr.bf16.mxu0 %v390_v0  ;;  %v57_v7 = vpack.c.bf16 %v56_v5, %v56_v5  ;;  %v251_v12 = vld [vmem:[%s507_s5] ss:$0 sm:$0xff]  ;;  %s394_s5 = smov 96   ;;  %p337_p2 = scmp.ne.s32.totalorder %s233_s10, %s336_s11 }
  0x2b   :  { %p342_p4 = scmp.lt.s32.totalorder %s336_s11, %s336_s11 }
  0x2c   :  { %269 = vmatmul.mubr.msk.bf16.vlgmr.msra.gmra.mrb[0].mxu1 %vm124_vm1, %v53_v6 }
  0x2d   :  { %261 = vmatpush3.bf16.msra.mxu0 %v283_v3  ;;  %p343_p5 = por %p342_p4, %p341_p3 }
  0x2f   :  { %p344_p6 = pnand %p343_p5, %p337_p2 }
  0x30   :  { %263 = vmatmul.mubr.msk.bf16.vlgmr.msra.gmra.mrb[0].mxu0 %vm74_vm2, %v57_v7 }
  0xff   :  { %v162_v8 = vpop.f32.mrb[0].mxu1 }
 0x100   :  { %v270_v9 = vpop.f32.mrb[1].mxu1 }
 0x101   :  { %v165_v10 = vpop.f32.mrb[2].mxu1 }
 0x102   :  { %v271_v13 = vpop.f32.mrb[3].mxu1 }
 0x103   :  { %v112_v11 = vpop.f32.mrb[0].mxu0 }
 0x104   :  { %v163_v14 = vadd.f32 %v162_v8, %v112_v11  ;;  %v264_v15 = vpop.f32.mrb[1].mxu0 }
 0x105   :  { %v115_v16 = vpop.f32.mrb[2].mxu0 }
 0x106   :  { %v175_v17 = vadd.f32 %v251_v12, %v163_v14  ;;  %v265_v18 = vpop.f32.mrb[3].mxu0 }
 0x108   :  { %284 = vtanh.f32 %v175_v17  ;;  %v252_v21 = vmul.f32 -1.442695, %v175_v17 }
 0x10a   :  { %286 = vpow2.f32 %v252_v21 }
 0x112   :  { %v285_v19 = vpop.eup %284 }
 0x113   :  { %190 = vrot.lane.b32.xlu0 %v285_v19, %s392_s0 }
 0x114   :  { %v287_v22 = vpop.eup %286 }
 0x115   :  { %v179_v23 = vadd.f32 1.0, %v287_v22 }
 0x117   :  { %185 = vrot.lane.b32.xlu0 %v183_v20, %s393_s8  ;;  %288 = vrcp.f32 %v179_v23 }
 0x121   :  { %v289_v24 = vpop.eup %288 }
 0x185   :  { %v191_v25 = vpop.permute.xlu0 %190 }
 0x186   :  { %v193_v26 = vmul.f32 %v289_v24, %v191_v25 }
 0x188   :  { %195 = vrot.lane.b32.xlu1 %v193_v26, %s393_s8 }
 0x189   :  { %v186_v27 = vpop.permute.xlu0 %185 }
 0x18a   :  { %v188_v28 = vmul.f32 %v289_v24, %v186_v27 }
 0x1fa   :  { %v196_v29 = vpop.permute.xlu1 %195 }
 0x1fb   :  { %v198_v30 = vadd.f32 %v196_v29, %v188_v28 }
 0x1fd   :  { %290 = vtanh.f32 %v198_v30 }
 0x207   :  { %v291_v31 = vpop.eup %290 }
 0x208   :  { %201 = vrot.lane.b32.xlu1 %v291_v31, %s392_s0 }
 0x20c   :  { %212 = vrot.lane.b32.xlu1 %v198_v30, %s394_s5 }
 0x27a   :  { %v202_v32 = vpop.permute.xlu1 %201 }
 0x27b   :  { %v204_v33 = vmul.f32 %v289_v24, %v202_v32 }
 0x27d   :  { %206 = vrot.lane.b32.xlu0 %v204_v33, %s393_s8 }
 0x27e   :  { %v213_v34 = vpop.permute.xlu1 %212 }
 0x27f   :  { %215 = vst.msk [vmem:[#allocation8] sm:$0x3] %vm209_vm3, %v213_v34 }
 0x280   :  { %347 = shalt.err (!%p344_p6)
}
 0x281   :  { %s348_s14 = scalar_lea.hbm %s509_s7, 32 }
 0x282   :  { %p349_p7 = scmp.ne.s32.totalorder %s509_s7, %s348_s14  ;;  %p352_p8 = scmp.lt.u32.totalorder %s348_s14, %s509_s7 }
 0x284   :  { %p354_p9 = pnand %p352_p8, %p349_p7 }
 0x286   :  { %357 = shalt.err (!%p354_p9)
}
 0x287   :  { %235 = dma.vmem_to_hbm [thread:$0]  %s233_s10, 32, %s509_s7, [#allocation9]  }
 0x288   :  { %s396_s21 = smov [#allocation7]  }
 0x289   :  { %s222_s22 = sshll.u32 %s396_s21, 4  ;;  %s223_s22 = int_to_ptr.vmem [resolvable:$true] %s222_s22 }
 0x28a   :  { %s358_s1 = scalar_lea.vmem %s223_s22, 32  ;;  %p363_p11 = scmp.lt.s32.totalorder %s223_s22, %s223_s22 }
 0x28b   :  { %p359_p10 = scmp.ne.s32.totalorder %s223_s22, %s358_s1  ;;  %p364_p12 = scmp.lt.s32.totalorder %s358_s1, %s358_s1 }
 0x28d   :  { %p365_p13 = por %p364_p12, %p363_p11 }
 0x28f   :  { %p366_p0 = pnand %p365_p13, %p359_p10 }
 0x2ef   :  { %v207_v35 = vpop.permute.xlu0 %206 }
 0x2f0   :  { %210 = vst.msk [vmem:[#allocation7] sm:$0x3] %vm209_vm3, %v207_v35 }
 0x2f1   :  { %369 = shalt.err (!%p366_p0)
}
 0x2f2   :  { %s370_s25 = scalar_lea.hbm %s508_s6, 32 }
 0x2f3   :  { %p371_p1 = scmp.ne.s32.totalorder %s508_s6, %s370_s25  ;;  %p374_p2 = scmp.lt.u32.totalorder %s370_s25, %s508_s6 }
 0x2f5   :  { %p376_p3 = pnand %p374_p2, %p371_p1 }
 0x2f7   :  { %379 = shalt.err (!%p376_p3)
}
 0x2f8   :  { %225 = dma.vmem_to_hbm [thread:$0]  %s223_s22, 32, %s508_s6, [#allocation4]  }
 0x2f9   :  { %384 = dma.done.wait [#allocation4], 32  }
 0x2fa   :  { %385 = vsyncadd [#allocation4], 4294967264 }
 0x2fb   :  { %386 = dma.done.wait [#allocation9], 32  }
 0x2fc   :  { %387 = vsyncadd [#allocation9], 4294967264 }
 0x2fd   :  { %242 = vsyncpa [#allocation3], 1 }
 0x2fe   :  { %243 = vsyncpa [#allocation6], 1 }
 0x2ff   :  { %244 = vsyncpa [#allocation4], 1 }
 0x300   :  { %245 = vsyncpa [#allocation9], 1 }

</bundles_post_ra>
